<compile_context>
chip_gen: v5e
topology: v5e:2x2
jax: 0.10.0
libtpu: 0.0.40
codegen_flags: <defaults>
</compile_context>

<pallas_src>
import jax
import jax.numpy as jnp
from jax.experimental import pallas as pl
from jax.experimental.pallas import tpu as pltpu

P_DROP = 0.1
LANES = 512            # lane-dense output: large multiple of 128 -> unmasked stores
MAX_BLOCK_ROWS = 512   # 512x512 f32 tile = 1 MiB; 2 ins + 1 out double-buffered ~ 6 MiB VMEM


def _round_up(n, m):
    return ((n + m - 1) // m) * m


def _m2_kernel(randn_ref, x_ref, noise_ref, out_ref):
    """Elementwise: out = (2 * dropout(x, 0.1) + r) ** r on one lane-dense tile."""
    r = randn_ref[0]                                   # torch.randn(1) scalar (SMEM)
    keep = noise_ref[...] >= jnp.float32(P_DROP)       # dropout keep mask
    scale = jnp.float32(2.0 / (1.0 - P_DROP))          # fold `2 *` into inverted-dropout scale
    x2 = jnp.where(keep, x_ref[...] * scale, jnp.float32(0.0))
    # NaN for negative base with non-integer exponent, matching torch's (x2+r)**r.
    out_ref[...] = jnp.power(x2 + r, r)


def m1_forward(x, key):
    """x: float32 tensor of any shape. Returns (m2_out, x4); x4 is the module output."""
    orig_shape = x.shape
    n = int(x.size)
    k_drop, k_randn, k_rand = jax.random.split(key, 3)

    randn_val = jax.random.normal(k_randn, (1,), dtype=jnp.float32)   # torch.randn(1)
    u_val = jax.random.uniform(k_rand, (1,), dtype=jnp.float32)       # torch.rand(1)

    # ---- lane-dense 2D slab layout ----
    rows_needed = max(1, pl.cdiv(n, LANES))
    block_rows = min(MAX_BLOCK_ROWS, _round_up(rows_needed, 8))
    total_rows = _round_up(rows_needed, block_rows)
    padded = total_rows * LANES

    x_flat = jnp.zeros((padded,), jnp.float32).at[:n].set(
        x.reshape(-1).astype(jnp.float32))
    x2d = x_flat.reshape(total_rows, LANES)
    # Dropout uniforms generated in the wrapper (no pltpu.prng_* in the kernel).
    noise2d = jax.random.uniform(k_drop, (total_rows, LANES), dtype=jnp.float32)

    grid = (total_rows // block_rows,)

    m2_out_2d = pl.pallas_call(
        _m2_kernel,
        out_shape=jax.ShapeDtypeStruct((total_rows, LANES), jnp.float32),
        grid=grid,
        in_specs=[
            pl.BlockSpec(memory_space=pltpu.MemorySpace.SMEM),        # randn scalar
            pl.BlockSpec((block_rows, LANES), lambda i: (i, 0)),      # x tile
            pl.BlockSpec((block_rows, LANES), lambda i: (i, 0)),      # dropout noise tile
        ],
        out_specs=pl.BlockSpec((block_rows, LANES), lambda i: (i, 0)),
        compiler_params=pltpu.CompilerParams(
            dimension_semantics=("parallel",),
        ),
        cost_estimate=pl.CostEstimate(
            flops=5 * padded,
            transcendentals=2 * padded,          # exp + log per element for pow
            bytes_accessed=3 * padded * 4 + 4,   # x in, noise in, m2_out out, scalar
        ),
    )(randn_val, x2d, noise2d)

    m2_out = m2_out_2d.reshape(-1)[:n].reshape(orig_shape)

    # m1's actual return value: x4 = rand(1) ** rand(1). A single scalar,
    # independent of x -> computed with plain jnp (hoisted out of the kernel).
    x4 = jnp.power(u_val, u_val)
    return m2_out, x4


if __name__ == "__main__":
    key = jax.random.PRNGKey(0)
    kx, kfwd = jax.random.split(key)
    # Same shape as the PyTorch spec: x1 = torch.randn(1, 2, 2)
    x1 = jax.random.normal(kx, (1, 2, 2), dtype=jnp.float32)

    m2_out, x4 = m1_forward(x1, kfwd)
    jax.block_until_ready(m2_out)
    jax.block_until_ready(x4)

    assert m2_out.shape == x1.shape and m2_out.dtype == jnp.float32
    assert x4.shape == (1,) and x4.dtype == jnp.float32
    assert bool(jnp.isfinite(x4[0]))
    print("KERNEL_OK")
</pallas_src>

<mosaic_0001>
module attributes {stable_mosaic.version = 11 : i64} {
  func.func @_m2_kernel(%arg0: i32, %arg1: memref<1xf32, #tpu.memory_space<smem>>, %arg2: memref<8x512xf32, #tpu.memory_space<vmem>>, %arg3: memref<8x512xf32, #tpu.memory_space<vmem>>, %arg4: memref<8x512xf32, #tpu.memory_space<vmem>>) attributes {dimension_semantics = [#tpu.dimension_semantics<parallel>], iteration_bounds = array<i64: 1>, scalar_prefetch = 0 : i64, scratch_operands = 0 : i64, tpu.core_type = #tpu.core_type<tc>, window_params = [{transform_indices = @transform_0, window_bounds = array<i64: 1>}, {transform_indices = @transform_1, window_bounds = array<i64: 8, 512>}, {transform_indices = @transform_2, window_bounds = array<i64: 8, 512>}, {transform_indices = @transform_3, window_bounds = array<i64: 8, 512>}]} {
    %c0 = arith.constant 0 : index
    %0 = memref.load %arg1[%c0] : memref<1xf32, #tpu.memory_space<smem>>
    %c0_0 = arith.constant 0 : index
    %c0_1 = arith.constant 0 : index
    %1 = vector.load %arg3[%c0_0, %c0_1] : memref<8x512xf32, #tpu.memory_space<vmem>>, vector<8x512xf32>
    %cst = arith.constant 1.000000e-01 : f32
    %2 = vector.broadcast %cst : f32 to vector<8x512xf32>
    %3 = arith.cmpf oge, %1, %2 : vector<8x512xf32>
    %c0_2 = arith.constant 0 : index
    %c0_3 = arith.constant 0 : index
    %4 = vector.load %arg2[%c0_2, %c0_3] : memref<8x512xf32, #tpu.memory_space<vmem>>, vector<8x512xf32>
    %cst_4 = arith.constant 2.22222233 : f32
    %5 = vector.broadcast %cst_4 : f32 to vector<8x512xf32>
    %6 = arith.mulf %4, %5 : vector<8x512xf32>
    %cst_5 = arith.constant 0.000000e+00 : f32
    %7 = vector.broadcast %cst_5 : f32 to vector<8x512xf32>
    %8 = arith.select %3, %6, %7 : vector<8x512xi1>, vector<8x512xf32>
    %9 = vector.broadcast %0 : f32 to vector<8x512xf32>
    %10 = arith.addf %8, %9 : vector<8x512xf32>
    %11 = vector.broadcast %0 : f32 to vector<8x512xf32>
    %12 = math.powf %10, %11 : vector<8x512xf32>
    %c0_6 = arith.constant 0 : index
    %c0_7 = arith.constant 0 : index
    %13 = vector.load %arg4[%c0_6, %c0_7] : memref<8x512xf32, #tpu.memory_space<vmem>>, vector<8x512xf32>
    tpu.vector_store %arg4[%c0_6, %c0_7], %12 {strides = array<i32>} : memref<8x512xf32, #tpu.memory_space<vmem>>, vector<8x512xf32>,
    return
  }
  func.func @transform_0(%arg0: i32) -> i32 {
    %c0_i32 = arith.constant 0 : i32
    %c0_i32_0 = arith.constant 0 : i32
    return %c0_i32 : i32
  }
  func.func @transform_1(%arg0: i32) -> (i32, i32) {
    %c0_i32 = arith.constant 0 : i32
    %c0_i32_0 = arith.constant 0 : i32
    return %arg0, %c0_i32 : i32, i32
  }
  func.func @transform_2(%arg0: i32) -> (i32, i32) {
    %c0_i32 = arith.constant 0 : i32
    %c0_i32_0 = arith.constant 0 : i32
    return %arg0, %c0_i32 : i32, i32
  }
  func.func @transform_3(%arg0: i32) -> (i32, i32) {
    %c0_i32 = arith.constant 0 : i32
    %c0_i32_0 = arith.constant 0 : i32
    return %arg0, %c0_i32 : i32, i32
  }
}

</mosaic_0001>

<bundles_post_ra>
// kernel: tpu_custom_call.1
= control target key start
LH: loop header
LB: loop body
LE: loop exit
PB: predicated region body
PF: predicated region fallthrough
CT: control target
= control target key end

     0   :  { %9 = vsyncpa [#allocation4], 0  ;;  %s1064_s0 = inlined_call_operand.<no memory space> [shape: f32[1], index: 0, kind: input, shape index: {}]   ;;  %s1065_s1 = inlined_call_operand.hbm [shape: f32[8,512], index: 1, kind: input, shape index: {}]   ;;  %s1066_s2 = inlined_call_operand.hbm [shape: f32[8,512], index: 2, kind: input, shape index: {}]   ;;  %s1067_s3 = inlined_call_operand.hbm [shape: f32[8,512], index: 3, kind: output, shape index: {}]  }
   0x1   :  { %10 = vsyncpa [#allocation7], 0 }
   0x2   :  { %11 = vsyncpa [#allocation5], 0  ;;  %s19_s14 = sshll.u32 %s1065_s1, 4  ;;  %s591_s15 = smov [#allocation3]   ;;  %s20_s14 = int_to_ptr.hbm [resolvable:$true] %s19_s14 }
   0x3   :  { %s21_s16 = sshll.u32 %s591_s15, 4  ;;  %s30_s19 = sshll.u32 %s1066_s2, 4  ;;  %s22_s16 = int_to_ptr.vmem [resolvable:$true] %s21_s16  ;;  %s31_s19 = int_to_ptr.hbm [resolvable:$true] %s30_s19 }
   0x4   :  { %24 = dma.hbm_to_vmem [thread:$0]  %s20_s14, 512, %s22_s16, [#allocation4]  }
   0x5   :  { %s592_s20 = smov [#allocation6]  }
   0x6   :  { %s32_s21 = sshll.u32 %s592_s20, 4  ;;  %s33_s21 = int_to_ptr.vmem [resolvable:$true] %s32_s21 }
   0x7   :  { %35 = dma.hbm_to_vmem [thread:$0]  %s31_s19, 512, %s33_s21, [#allocation7]  }
   0x8   :  { %585 = dma.done.wait [#allocation4], 512  }
   0x9   :  { %586 = vsyncadd [#allocation4], 4294966784 }
   0xa   :  { %587 = dma.done.wait [#allocation7], 512  }
   0xb   :  { %588 = vsyncadd [#allocation7], 4294966784  ;;  %v45_v0 = vld [vmem:[#allocation6] sm:$0xff]  ;;  %v46_v2 = vld [vmem:[#allocation6 + $0x8] sm:$0xff]  ;;  %v625_v4 = vstv %s1064_s0  ;;  %s595_s0 = smov [#allocation8]   ;;  %s85_s25 = sshll.u32 %s1067_s3, 4  ;;  %s86_s25 = int_to_ptr.hbm [resolvable:$true] %s85_s25 }
   0xc   :  { %v53_v1 = vld [vmem:[#allocation3] sm:$0xff]  ;;  %vm49_vm0 = vcmp.ge.f32.partialorder %v45_v0, 0.1  ;;  %vm50_vm1 = vcmp.ge.f32.partialorder %v46_v2, 0.1  ;;  %v54_v5 = vld [vmem:[#allocation3 + $0x8] sm:$0xff]  ;;  %v149_v52 = vceil.f32 %v625_v4  ;;  %v150_v53 = vfloor.f32 %v625_v4 }
   0xd   :  { %v57_v3 = vmul.f32 2.2222223, %v53_v1  ;;  %v47_v6 = vld [vmem:[#allocation6 + $0x10] sm:$0xff]  ;;  %v58_v9 = vmul.f32 2.2222223, %v54_v5  ;;  %v56_v27 = vld [vmem:[#allocation3 + $0x18] sm:$0xff] }
   0xe   :  { %v55_v7 = vld [vmem:[#allocation3 + $0x10] sm:$0xff]  ;;  %vm51_vm2 = vcmp.ge.f32.partialorder %v47_v6, 0.1  ;;  %v48_v30 = vld [vmem:[#allocation6 + $0x18] sm:$0xff]  ;;  %v60_v34 = vmul.f32 2.2222223, %v56_v27 }
   0xf   :  { %v61_v8 = vsel %vm49_vm0, %v57_v3, 0.0  ;;  %v59_v11 = vmul.f32 2.2222223, %v55_v7  ;;  %v62_v12 = vsel %vm50_vm1, %v58_v9, 0.0  ;;  %vm52_vm4 = vcmp.ge.f32.partialorder %v48_v30, 0.1 }
  0x10   :  { %v628_v10 = vadd.f32 %v625_v4, %v61_v8  ;;  %v634_v14 = vadd.f32 %v625_v4, %v62_v12  ;;  %v64_v41 = vsel %vm52_vm4, %v60_v34, 0.0  ;;  %v665_v44 = vand.u32 2147483647, %v625_v4  ;;  %s83_s2 = sshll.u32 %s595_s0, 4  ;;  %s84_s2 = int_to_ptr.vmem [resolvable:$true] %s83_s2 }
  0x11   :  { %v63_v15 = vsel %vm51_vm2, %v59_v11, 0.0  ;;  %v672_v50 = vadd.f32 %v625_v4, %v64_v41  ;;  %vm148_vm6 = vcmp.lt.s32.totalorder %v625_v4, 0  ;;  %vm1071_vm15 = vcmp.lt.f32.partialorder %v625_v4, 0 }
  0x12   :  { %v631_v13 = vand.u32 2147483647, %v628_v10  ;;  %v638_v17 = vand.u32 2147483647, %v634_v14  ;;  %v642_v20 = vadd.f32 %v625_v4, %v63_v15  ;;  %v156_v57 = vfloor.f32 %v665_v44 }
  0x13   :  { %v686_v0 = vand.u32 2147483647, %v672_v50  ;;  %v151_v2 = vsel %vm148_vm6, %v149_v52, %v150_v53  ;;  %vm1068_vm8 = vcmp.eq.f32.partialorder %v665_v44, 2139095040  ;;  %vm154_vm2 = vcmp.lt.f32.partialorder %v665_v44, 1266679808 }
  0x14   :  { %v102_v16 = vand.u32 8388607, %v631_v13  ;;  %v203_v19 = vand.u32 8388607, %v638_v17  ;;  %v647_v24 = vand.u32 2147483647, %v642_v20  ;;  %v157_v8 = vcvt.f32.s32 %v156_v57 }
  0x15   :  { %v98_v33 = vand.u32 2139095040, %v631_v13  ;;  %v199_v45 = vand.u32 2139095040, %v638_v17  ;;  %vm152_vm9 = vcmp.ne.f32.partialorder %v625_v4, %v151_v2  ;;  %vm134_vm10 = vcmp.eq.f32.partialorder %v631_v13, 0.0 }
  0x16   :  { %v103_v18 = vor.u32 8388608, %v102_v16  ;;  %v204_v22 = vor.u32 8388608, %v203_v19  ;;  %v304_v29 = vand.u32 8388607, %v647_v24  ;;  %v300_v63 = vand.u32 2139095040, %v647_v24  ;;  %vm704_vm14 = vmor %vm152_vm9, %vm1068_vm8 }
  0x17   :  { %v99_v39 = vshrl.u32 %v98_v33, 23  ;;  %v200_v58 = vshrl.u32 %v199_v45, 23  ;;  %vm135_vm11 = vcmp.lt.f32.partialorder %v631_v13, 0.0  ;;  %vm133_vm12 = vcmp.eq.f32.partialorder %v631_v13, 1.0  ;;  %vm160_vm1 = vmneg %vm704_vm14 }
  0x18   :  { %v105_v21 = vand.u32 8388607, %v103_v18  ;;  %v206_v25 = vand.u32 8388607, %v204_v22  ;;  %v305_v36 = vor.u32 8388608, %v304_v29  ;;  %v301_v27 = vshrl.u32 %v300_v63, 23 }
  0x19   :  { %v195_v51 = vadd.s32 4294967169, %v99_v39  ;;  %v296_v9 = vadd.s32 4294967169, %v200_v58  ;;  %vm136_vm13 = vweird.f32 %v631_v13  ;;  %vm167_vm6 = vcmp.gt.f32.partialorder %v631_v13, 1065353216 }
  0x1a   :  { %v644_v23 = vor.u32 1065353216, %v105_v21  ;;  %v657_v32 = vor.u32 1065353216, %v206_v25  ;;  %v307_v47 = vand.u32 8388607, %v305_v36  ;;  %v715_v41 = vadd.s32 4294967169, %v301_v27 }
  0x1b   :  { %v110_v1 = vadd.s32 1, %v195_v51  ;;  %v211_v36 = vadd.s32 1, %v296_v9  ;;  %vm180_vm8 = vcmp.eq.f32.partialorder %v628_v10, 3212836864 }
  0x1c   :  { %vm107_vm3 = vcmp.ge.f32.partialorder %v644_v23, 1.4142135  ;;  %v108_v26 = vmul.f32 0.5, %v644_v23  ;;  %vm208_vm5 = vcmp.ge.f32.partialorder %v657_v32, 1.4142135  ;;  %v209_v40 = vmul.f32 0.5, %v657_v32 }
  0x1d   :  { %v682_v60 = vor.u32 1065353216, %v307_v47  ;;  %v111_v19 = vsel %vm107_vm3, %v110_v1, %v195_v51  ;;  %v593_v47 = vmov 2139095040   ;;  %v212_v51 = vsel %vm208_vm5, %v211_v36, %v296_v9 }
  0x1e   :  { %v109_v28 = vsel %vm107_vm3, %v108_v26, %v644_v23  ;;  %v210_v46 = vsel %vm208_vm5, %v209_v40, %v657_v32  ;;  %v158_v26 = vand.u32 1, %v157_v8  ;;  %vm1069_vm3 = vcmp.eq.f32.partialorder %v628_v10, 0 }
  0x1f   :  { %v655_v31 = vadd.f32 -1.0, %v109_v28  ;;  %v676_v54 = vadd.f32 -1.0, %v210_v46  ;;  %vm309_vm7 = vcmp.ge.f32.partialorder %v682_v60, 1.4142135  ;;  %v310_v15 = vmul.f32 0.5, %v682_v60  ;;  %vm742_vm9 = vmand %vm1071_vm15, %vm1069_vm3 }
  0x20   :  { %vm159_vm0 = vcmp.eq.s32.totalorder %v158_v26, 1  ;;  %v312_v26 = vadd.s32 1, %v715_v41 }
  0x21   :  { %v113_v35 = vmul.f32 %v655_v31, %v655_v31  ;;  %v214_v59 = vmul.f32 %v676_v54, %v676_v54  ;;  %v311_v28 = vsel %vm309_vm7, %v310_v15, %v682_v60  ;;  %vm161_vm4 = vmand %vm159_vm0, %vm160_vm1  ;;  %vm235_vm0 = vcmp.eq.f32.partialorder %v638_v17, 0.0 }
  0x22   :  { %v708_v33 = vadd.f32 -1.0, %v311_v28  ;;  %vm751_vm5 = vmand %vm154_vm2, %vm161_vm4  ;;  %vm237_vm2 = vweird.f32 %v638_v17  ;;  %vm145_vm4 = vcmp.eq.f32.partialorder %v625_v4, 0 }
  0x23   :  { %v114_v37 = vmul.f32 0.12621109, %v113_v35  ;;  %v116_v38 = vmul.f32 -0.20706727, %v113_v35  ;;  %v215_v3 = vmul.f32 0.12621109, %v214_v59 }
  0x24   :  { %v217_v5 = vmul.f32 -0.20706727, %v214_v59 }
  0x25   :  { %v115_v42 = vadd.f32 0.21545328, %v114_v37  ;;  %v117_v43 = vadd.f32 -0.23896284, %v116_v38  ;;  %v216_v11 = vadd.f32 0.21545328, %v215_v3 }
  0x26   :  { %v218_v12 = vadd.f32 -0.23896284, %v217_v5  ;;  %v405_v37 = vand.u32 8388607, %v686_v0 }
  0x27   :  { %v118_v48 = vmul.f32 %v115_v42, %v113_v35  ;;  %v120_v49 = vmul.f32 %v117_v43, %v113_v35  ;;  %v219_v21 = vmul.f32 %v216_v11, %v214_v59  ;;  %v719_v42 = vmul.f32 %v708_v33, %v708_v33 }
  0x28   :  { %v221_v22 = vmul.f32 %v218_v12, %v214_v59  ;;  %v232_v11 = vcvt.s32.f32 %v212_v51 }
  0x29   :  { %v119_v55 = vadd.f32 0.28795174, %v118_v48  ;;  %v121_v56 = vadd.f32 -0.3607037, %v120_v49  ;;  %v220_v29 = vadd.f32 0.28795174, %v219_v21 }
  0x2a   :  { %v222_v30 = vadd.f32 -0.3607037, %v221_v22  ;;  %v316_v48 = vmul.f32 0.12621109, %v719_v42  ;;  %v318_v49 = vmul.f32 -0.20706727, %v719_v42 }
  0x2b   :  { %v122_v61 = vmul.f32 %v119_v55, %v113_v35  ;;  %v124_v62 = vmul.f32 %v121_v56, %v113_v35  ;;  %v223_v38 = vmul.f32 %v220_v29, %v214_v59 }
  0x2c   :  { %v225_v39 = vmul.f32 %v222_v30, %v214_v59  ;;  %v317_v56 = vadd.f32 0.21545328, %v316_v48  ;;  %v319_v57 = vadd.f32 -0.23896284, %v318_v49 }
  0x2d   :  { %v123_v6 = vadd.f32 0.48090908, %v122_v61  ;;  %v125_v7 = vadd.f32 -0.72134733, %v124_v62  ;;  %v224_v43 = vadd.f32 0.48090908, %v223_v38 }
  0x2e   :  { %v226_v45 = vadd.f32 -0.72134733, %v225_v39  ;;  %v406_v62 = vor.u32 8388608, %v405_v37  ;;  %v320_v2 = vmul.f32 %v317_v56, %v719_v42  ;;  %v322_v3 = vmul.f32 %v319_v57, %v719_v42 }
  0x2f   :  { %v126_v16 = vmul.f32 %v123_v6, %v113_v35  ;;  %v128_v18 = vmul.f32 %v655_v31, %v125_v7  ;;  %v131_v35 = vcvt.s32.f32 %v111_v19  ;;  %v227_v52 = vmul.f32 %v224_v43, %v214_v59 }
  0x30   :  { %v229_v53 = vmul.f32 %v676_v54, %v226_v45  ;;  %v594_v6 = vmov 0   ;;  %v321_v15 = vadd.f32 0.28795174, %v320_v2  ;;  %v408_v21 = vand.u32 8388607, %v406_v62 }
  0x31   :  { %v127_v25 = vadd.f32 1.442695, %v126_v16  ;;  %v228_v59 = vadd.f32 1.442695, %v227_v52  ;;  %v764_v7 = vsel %vm1071_vm15, 2139095040, %v594_v6  ;;  %v313_v43 = vsel %vm309_vm7, %v312_v26, %v715_v41 }
  0x32   :  { %v323_v16 = vadd.f32 -0.3607037, %v322_v3  ;;  %v324_v22 = vmul.f32 %v321_v15, %v719_v42  ;;  %v800_v30 = vor.u32 1065353216, %v408_v21  ;;  %v333_v56 = vcvt.s32.f32 %v313_v43 }
  0x33   :  { %v129_v34 = vadd.f32 %v128_v18, %v127_v25  ;;  %v230_v9 = vadd.f32 %v229_v53, %v228_v59  ;;  %v401_v61 = vand.u32 2139095040, %v686_v0 }
  0x34   :  { %v326_v25 = vmul.f32 %v323_v16, %v719_v42  ;;  %v325_v28 = vadd.f32 0.48090908, %v324_v22  ;;  %v411_v45 = vmul.f32 0.5, %v800_v30 }
  0x35   :  { %v130_v40 = vmul.f32 %v655_v31, %v129_v34  ;;  %v725_v31 = vsel %vm1071_vm15, 0, %v593_v47  ;;  %v231_v19 = vmul.f32 %v676_v54, %v230_v9 }
  0x36   :  { %v184_v32 = vxor.u32 2147483648, %v725_v31  ;;  %v327_v29 = vadd.f32 -0.72134733, %v326_v25  ;;  %v328_v38 = vmul.f32 %v325_v28, %v719_v42 }
  0x37   :  { %v132_v46 = vadd.f32 %v131_v35, %v130_v40  ;;  %v233_v54 = vadd.f32 %v232_v11, %v231_v19 }
  0x38   :  { %v779_v18 = vsel %vm751_vm5, %v184_v32, %v725_v31  ;;  %v330_v39 = vmul.f32 %v708_v33, %v327_v29  ;;  %v329_v60 = vadd.f32 1.442695, %v328_v38 }
  0x39   :  { %v137_v55 = vsel %vm136_vm13, %v631_v13, %v132_v46  ;;  %vm236_vm13 = vcmp.lt.f32.partialorder %v638_v17, 0.0  ;;  %v238_v35 = vsel %vm237_vm2, %v638_v17, %v233_v54 }
  0x3a   :  { %v138_v58 = vsel %vm135_vm11, nan, %v137_v55  ;;  %vm163_vm11 = vcmp.lt.f32.partialorder %v628_v10, 0  ;;  %v239_v37 = vsel %vm236_vm13, nan, %v238_v35  ;;  %vm264_vm13 = vcmp.lt.f32.partialorder %v634_v14, 0 }
  0x3b   :  { %v139_v63 = vsel %vm134_vm10, -inf, %v138_v58  ;;  %vm770_vm10 = vmxor %vm1071_vm15, %vm167_vm6  ;;  %v186_v27 = vsel %vm163_vm11, %v779_v18, %v725_v31  ;;  %vm188_vm6 = vcmp.ne.f32.partialorder %v628_v10, %v628_v10  ;;  %v240_v40 = vsel %vm235_vm0, -inf, %v239_v37 }
  0x3c   :  { %v140_v5 = vsel %vm133_vm12, 0.0, %v139_v63  ;;  %vm234_vm12 = vcmp.eq.f32.partialorder %v638_v17, 1.0  ;;  %vm178_vm1 = vmor %vm742_vm9, %vm770_vm10  ;;  %vm1072_vm9 = vcmp.eq.f32.partialorder %v634_v14, 0  ;;  %vm268_vm10 = vcmp.gt.f32.partialorder %v638_v17, 1065353216 }
  0x3d   :  { %v141_v12 = vmul.f32 %v140_v5, %v625_v4  ;;  %v179_v34 = vsel %vm178_vm1, 2139095040, %v594_v6  ;;  %vm810_vm3 = vmand %vm163_vm11, %vm704_vm14  ;;  %vm1070_vm1 = vcmp.ge.f32.partialorder %v800_v30, 1.4142135  ;;  %vm1073_vm11 = vcmp.ne.f32.partialorder %v625_v4, %v625_v4 }
  0x3e   :  { %v241_v42 = vsel %vm234_vm12, 0.0, %v240_v40  ;;  %vm835_vm0 = vmand %vm1071_vm15, %vm1072_vm9  ;;  %v181_v48 = vsel %vm180_vm8, 1065353216, %v179_v34  ;;  %v412_v52 = vsel %vm1070_vm1, %v411_v45, %v800_v30  ;;  %vm1089_vm8 = vcmp.lt.s32.totalorder %v628_v10, 0 }
  0x3f   :  { %505 = vpow2.f32 %v141_v12  ;;  %v242_v49 = vmul.f32 %v241_v42, %v625_v4  ;;  %vm848_vm7 = vmxor %vm1071_vm15, %vm268_vm10  ;;  %v331_v55 = vadd.f32 %v330_v39, %v329_v60  ;;  %v862_v57 = vadd.f32 -1.0, %v412_v52 }
  0x40   :  { %vm173_vm12 = vmand %vm1089_vm8, %vm751_vm5  ;;  %vm336_vm15 = vcmp.eq.f32.partialorder %v647_v24, 0.0  ;;  %vm337_vm10 = vcmp.lt.f32.partialorder %v647_v24, 0.0  ;;  %vm338_vm8 = vweird.f32 %v647_v24  ;;  %vm1092_vm9 = vcmp.eq.f32.partialorder %v665_v44, 2139095040 }
  0x41   :  { %507 = vpow2.f32 %v242_v49  ;;  %v332_v32 = vmul.f32 %v708_v33, %v331_v55  ;;  %v416_v59 = vmul.f32 %v862_v57, %v862_v57  ;;  %vm882_vm1 = vmor %vm188_vm6, %vm1073_vm11  ;;  %vm1094_vm6 = vcmp.eq.f32.partialorder %v631_v13, 2139095040 }
  0x42   :  { %vm901_vm11 = vmand %vm264_vm13, %vm704_vm14  ;;  %v402_v13 = vshrl.u32 %v401_v61, 23  ;;  %v287_v43 = vsel %vm264_vm13, %v779_v18, %v725_v31  ;;  %vm1111_vm13 = vcmp.eq.f32.partialorder %v665_v44, 2139095040 }
  0x43   :  { %v334_v2 = vadd.f32 %v333_v56, %v332_v32  ;;  %v417_v3 = vmul.f32 0.12621109, %v416_v59  ;;  %v419_v5 = vmul.f32 -0.20706727, %v416_v59 }
  0x44   :  { %v498_v34 = vadd.s32 4294967169, %v402_v13 }
  0x45   :  { %v506_v46 = vpop.eup %505  ;;  %v339_v15 = vsel %vm338_vm8, %v647_v24, %v334_v2  ;;  %v418_v16 = vadd.f32 0.21545328, %v417_v3  ;;  %v420_v19 = vadd.f32 -0.23896284, %v419_v5 }
  0x46   :  { %v170_v41 = vsel %vm810_vm3, 2143289344, %v506_v46  ;;  %vm1088_vm3 = vcmp.eq.f32.partialorder %v628_v10, 0  ;;  %v340_v25 = vsel %vm337_vm10, nan, %v339_v15 }
  0x47   :  { %v172_v53 = vsel %vm1088_vm3, %v764_v7, %v170_v41  ;;  %vm279_vm3 = vmor %vm835_vm0, %vm848_vm7  ;;  %v508_v21 = vpop.eup %507  ;;  %vm369_vm0 = vcmp.gt.f32.partialorder %v647_v24, 1065353216  ;;  %vm1097_vm7 = vcmp.eq.f32.partialorder %v625_v4, 1065353216  ;;  %v421_v28 = vmul.f32 %v418_v16, %v416_v59 }
  0x48   :  { %v174_v58 = vxor.u32 2147483648, %v172_v53  ;;  %v280_v11 = vsel %vm279_vm3, 2139095040, %v594_v6  ;;  %v271_v26 = vsel %vm901_vm11, 2143289344, %v508_v21  ;;  %vm1100_vm3 = vcmp.eq.f32.partialorder %v647_v24, 1.0 }
  0x49   :  { %v423_v35 = vmul.f32 %v420_v19, %v416_v59  ;;  %vm1101_vm11 = vcmp.eq.f32.partialorder %v634_v14, 3212836864  ;;  %v422_v40 = vadd.f32 0.28795174, %v421_v28  ;;  %v413_v41 = vadd.s32 1, %v498_v34 }
  0x4a   :  { %v175_v62 = vsel %vm173_vm12, %v174_v58, %v172_v53  ;;  %vm1093_vm12 = vcmp.eq.f32.partialorder %v628_v10, 1065353216  ;;  %v282_v37 = vsel %vm1101_vm11, 1065353216, %v280_v11 }
  0x4b   :  { %v182_v33 = vsel %vm1092_vm9, %v181_v48, %v175_v62  ;;  %vm192_vm2 = vmor %vm1093_vm12, %vm145_vm4  ;;  %vm289_vm9 = vcmp.ne.f32.partialorder %v634_v14, %v634_v14  ;;  %vm366_vm12 = vcmp.eq.f32.partialorder %v642_v20, 0  ;;  %v424_v46 = vadd.f32 -0.3607037, %v423_v35 }
  0x4c   :  { %v187_v8 = vsel %vm1094_vm6, %v186_v27, %v182_v33  ;;  %v341_v27 = vsel %vm336_vm15, -inf, %v340_v25  ;;  %vm1102_vm15 = vcmp.ne.f32.partialorder %v625_v4, %v625_v4  ;;  %vm269_vm6 = vcmp.eq.f32.partialorder %v638_v17, 2139095040 }
  0x4d   :  { %v191_v12 = vsel %vm882_vm1, 2143289344, %v187_v8  ;;  %vm1098_vm1 = vcmp.eq.f32.partialorder %v634_v14, 0  ;;  %vm944_vm8 = vmor %vm289_vm9, %vm1102_vm15  ;;  %v425_v47 = vmul.f32 %v422_v40, %v416_v59  ;;  %v427_v48 = vmul.f32 %v424_v46, %v416_v59 }
  0x4e   :  { %v193_v22 = vsel %vm192_vm2, 1065353216, %v191_v12  ;;  %v273_v29 = vsel %vm1098_vm1, %v764_v7, %v271_v26  ;;  %vm1099_vm2 = vcmp.lt.s32.totalorder %v634_v14, 0 }
  0x4f   :  { %v194_v54 = vsel %vm1097_vm7, %v628_v10, %v193_v22  ;;  %vm274_vm10 = vmand %vm1099_vm2, %vm751_vm5  ;;  %v342_v10 = vsel %vm1100_vm3, 0.0, %v341_v27  ;;  %v275_v36 = vxor.u32 2147483648, %v273_v29  ;;  %vm1105_vm7 = vcmp.lt.f32.partialorder %v625_v4, 0 }
  0x50   :  { %74 = vst [vmem:[#allocation8] sm:$0xff] %v194_v54  ;;  %v343_v39 = vmul.f32 %v342_v10, %v625_v4  ;;  %vm958_vm1 = vmand %vm1105_vm7, %vm366_vm12  ;;  %vm1112_vm3 = vcmp.eq.f32.partialorder %v634_v14, 1065353216  ;;  %v426_v51 = vadd.f32 0.48090908, %v425_v47  ;;  %v428_v53 = vadd.f32 -0.72134733, %v427_v48 }
  0x51   :  { %v276_v42 = vsel %vm274_vm10, %v275_v36, %v273_v29  ;;  %vm1108_vm9 = vmmov %vm1105_vm7  ;;  %vm365_vm10 = vcmp.lt.f32.partialorder %v642_v20, 0  ;;  %vm368_vm7 = vcmp.lt.s32.totalorder %v642_v20, 0 }
  0x52   :  { %509 = vpow2.f32 %v343_v39  ;;  %vm966_vm2 = vmxor %vm1108_vm9, %vm369_vm0  ;;  %v283_v60 = vsel %vm1111_vm13, %v282_v37, %v276_v42  ;;  %v429_v56 = vmul.f32 %v426_v51, %v416_v59  ;;  %v431_v32 = vmul.f32 %v862_v57, %v428_v53 }
  0x53   :  { %vm293_vm11 = vmor %vm1112_vm3, %vm145_vm4  ;;  %v288_v49 = vsel %vm269_vm6, %v287_v43, %v283_v60  ;;  %vm1113_vm6 = vcmp.eq.f32.partialorder %v625_v4, 1065353216  ;;  %vm367_vm13 = vcmp.eq.f32.partialorder %v642_v20, 1065353216  ;;  %vm370_vm3 = vcmp.eq.f32.partialorder %v647_v24, 2139095040 }
  0x54   :  { %v292_v52 = vsel %vm944_vm8, 2143289344, %v288_v49  ;;  %vm380_vm0 = vmor %vm958_vm1, %vm966_vm2  ;;  %vm1114_vm8 = vcmp.ge.f32.partialorder %v800_v30, 1.4142135  ;;  %vm382_vm1 = vcmp.eq.f32.partialorder %v642_v20, 3212836864  ;;  %v430_v33 = vadd.f32 1.442695, %v429_v56 }
  0x55   :  { %v294_v55 = vsel %vm293_vm11, 1065353216, %v292_v52  ;;  %vm371_vm15 = vmand %vm365_vm10, %vm704_vm14  ;;  %v414_v61 = vsel %vm1114_vm8, %v413_v41, %v498_v34  ;;  %v381_v63 = vsel %vm380_vm0, 2139095040, %v594_v6  ;;  %vm390_vm2 = vcmp.ne.f32.partialorder %v642_v20, %v642_v20 }
  0x56   :  { %v295_v58 = vsel %vm1113_vm6, %v634_v14, %v294_v55  ;;  %vm375_vm9 = vmand %vm368_vm7, %vm751_vm5  ;;  %v432_v14 = vadd.f32 %v431_v32, %v430_v33  ;;  %v434_v30 = vcvt.s32.f32 %v414_v61  ;;  %v383_v5 = vsel %vm382_vm1, 1065353216, %v381_v63 }
  0x57   :  { %75 = vst [vmem:[#allocation8 + $0x8] sm:$0xff] %v295_v58  ;;  %v388_v8 = vsel %vm365_vm10, %v779_v18, %v725_v31  ;;  %vm439_vm0 = vweird.f32 %v686_v0  ;;  %vm394_vm6 = vmor %vm367_vm13, %vm145_vm4  ;;  %vm438_vm7 = vcmp.lt.f32.partialorder %v686_v0, 0.0  ;;  %vm437_vm10 = vcmp.eq.f32.partialorder %v686_v0, 0.0 }
  0x58   :  { %v510_v62 = vpop.eup %509  ;;  %v433_v9 = vmul.f32 %v862_v57, %v432_v14  ;;  %vm436_vm8 = vcmp.eq.f32.partialorder %v686_v0, 1.0  ;;  %vm1117_vm1 = vcmp.eq.f32.partialorder %v625_v4, 1065353216  ;;  %vm1118_vm13 = vcmp.lt.f32.partialorder %v625_v4, 0 }
  0x59   :  { %v372_v2 = vsel %vm371_vm15, 2143289344, %v510_v62  ;;  %vm1116_vm15 = vcmp.eq.f32.partialorder %v665_v44, 2139095040 }
  0x5a   :  { %v374_v59 = vsel %vm366_vm12, %v764_v7, %v372_v2  ;;  %vm1115_vm12 = vcmp.ne.f32.partialorder %v625_v4, %v625_v4  ;;  %v435_v24 = vadd.f32 %v434_v30, %v433_v9 }
  0x5b   :  { %v376_v3 = vxor.u32 2147483648, %v374_v59  ;;  %vm392_vm11 = vmor %vm390_vm2, %vm1115_vm12  ;;  %vm470_vm2 = vcmp.gt.f32.partialorder %v686_v0, 1065353216 }
  0x5c   :  { %v440_v15 = vsel %vm439_vm0, %v686_v0, %v435_v24  ;;  %vm1119_vm12 = vmmov %vm1118_vm13  ;;  %vm466_vm0 = vcmp.lt.f32.partialorder %v672_v50, 0 }
  0x5d   :  { %v377_v11 = vsel %vm375_vm9, %v376_v3, %v374_v59  ;;  %v441_v19 = vsel %vm438_vm7, nan, %v440_v15  ;;  %vm467_vm9 = vcmp.eq.f32.partialorder %v672_v50, 0  ;;  %vm469_vm7 = vcmp.lt.s32.totalorder %v672_v50, 0 }
  0x5e   :  { %v384_v13 = vsel %vm1116_vm15, %v383_v5, %v377_v11  ;;  %v442_v22 = vsel %vm437_vm10, -inf, %v441_v19  ;;  %vm483_vm10 = vcmp.eq.f32.partialorder %v672_v50, 3212836864 }
  0x5f   :  { %v389_v12 = vsel %vm370_vm3, %v388_v8, %v384_v13  ;;  %v443_v25 = vsel %vm436_vm8, 0.0, %v442_v22  ;;  %vm479_vm3 = vmand %vm1118_vm13, %vm467_vm9  ;;  %vm1120_vm13 = vcmp.ne.f32.partialorder %v625_v4, %v625_v4 }
  0x60   :  { %v393_v57 = vsel %vm392_vm11, 2143289344, %v389_v12  ;;  %v444_v54 = vmul.f32 %v443_v25, %v625_v4  ;;  %vm480_vm11 = vmxor %vm1119_vm12, %vm470_vm2  ;;  %vm471_vm2 = vcmp.eq.f32.partialorder %v686_v0, 2139095040  ;;  %vm1122_vm12 = vcmp.eq.f32.partialorder %v625_v4, 1065353216 }
  0x61   :  { %v395_v16 = vsel %vm394_vm6, 1065353216, %v393_v57  ;;  %vm481_vm15 = vmor %vm479_vm3, %vm480_vm11  ;;  %vm1121_vm3 = vcmp.eq.f32.partialorder %v665_v44, 2139095040 }
  0x62   :  { %v396_v21 = vsel %vm1117_vm1, %v642_v20, %v395_v16  ;;  %511 = vpow2.f32 %v444_v54  ;;  %vm472_vm6 = vmand %vm466_vm0, %vm704_vm14  ;;  %v482_v26 = vsel %vm481_vm15, 2139095040, %v594_v6  ;;  %vm491_vm1 = vcmp.ne.f32.partialorder %v672_v50, %v672_v50 }
  0x63   :  { %76 = vst [vmem:[#allocation8 + $0x10] sm:$0xff] %v396_v21  ;;  %vm476_vm8 = vmand %vm469_vm7, %vm751_vm5  ;;  %vm468_vm14 = vcmp.eq.f32.partialorder %v672_v50, 1065353216  ;;  %v484_v29 = vsel %vm483_vm10, 1065353216, %v482_v26  ;;  %v489_v6 = vsel %vm466_vm0, %v779_v18, %v725_v31 }
  0x64   :  { %vm495_vm5 = vmor %vm468_vm14, %vm145_vm4 }
  0x68   :  { %v512_v20 = vpop.eup %511 }
  0x69   :  { %v473_v27 = vsel %vm472_vm6, 2143289344, %v512_v20 }
  0x6a   :  { %v475_v28 = vsel %vm467_vm9, %v764_v7, %v473_v27  ;;  %vm493_vm9 = vmor %vm491_vm1, %vm1120_vm13 }
  0x6b   :  { %v477_v23 = vxor.u32 2147483648, %v475_v28 }
  0x6d   :  { %v478_v10 = vsel %vm476_vm8, %v477_v23, %v475_v28 }
  0x6e   :  { %v485_v1 = vsel %vm1121_vm3, %v484_v29, %v478_v10 }
  0x6f   :  { %v490_v0 = vsel %vm471_vm2, %v489_v6, %v485_v1 }
  0x70   :  { %v494_v7 = vsel %vm493_vm9, 2143289344, %v490_v0 }
  0x71   :  { %v496_v31 = vsel %vm495_vm5, 1065353216, %v494_v7 }
  0x72   :  { %v497_v18 = vsel %vm1122_vm12, %v672_v50, %v496_v31 }
  0x73   :  { %77 = vst [vmem:[#allocation8 + $0x18] sm:$0xff] %v497_v18 }
  0x74   :  { %88 = dma.vmem_to_hbm [thread:$0]  %s84_s2, 512, %s86_s25, [#allocation5]  }
  0x75   :  { %589 = dma.done.wait [#allocation5], 512  }
  0x76   :  { %590 = vsyncadd [#allocation5], 4294966784 }
  0x77   :  { %93 = vsyncpa [#allocation4], 1 }
  0x78   :  { %94 = vsyncpa [#allocation7], 1 }
  0x79   :  { %95 = vsyncpa [#allocation5], 1 }

</bundles_post_ra>
